<compile_context>
chip_gen: v7x
topology: tpu7x:2x2x1
jax: 0.10.0
libtpu: 0.0.40
codegen_flags: <defaults>
</compile_context>

<pallas_src>
import functools

import jax
import jax.numpy as jnp
from jax.experimental import pallas as pl
from jax.experimental.pallas import tpu as pltpu


def _round_up(x, m):
    return (x + m - 1) // m * m


# ---------------------------------------------------------------------------
# Kernel body: fully fused MLP over one batch tile.  All weights/biases are
# grid-invariant (resident in VMEM); intermediate activations stay in
# vregs/VMEM and never touch HBM.
# ---------------------------------------------------------------------------
def _mlp_kernel(*refs, n_layers, acc_dtype=jnp.float32):
    # refs = (x_ref, w1_ref, b1_ref, ..., wL_ref, bL_ref, o_ref)
    x_ref = refs[0]
    o_ref = refs[-1]
    compute_dtype = refs[1].dtype           # weight dtype drives the MXU input dtype
    h = x_ref[...].astype(compute_dtype)    # cheap VPU cast; no wrapper HBM pass
    for i in range(n_layers):
        w_ref = refs[1 + 2 * i]
        b_ref = refs[2 + 2 * i]
        acc = jnp.dot(h, w_ref[...], preferred_element_type=acc_dtype)  # MXU, f32 acc
        acc = acc + b_ref[...].astype(acc_dtype)                        # VPU
        acc = jnp.maximum(acc, 0.0)                                     # torch.relu
        if i + 1 < n_layers:
            h = acc.astype(compute_dtype)
        else:
            o_ref[...] = acc.astype(o_ref.dtype)


# ---------------------------------------------------------------------------
# Hardware probing (best-effort; safe fallbacks).
# ---------------------------------------------------------------------------
def _tpu_vmem_capacity_bytes():
    try:
        return int(pltpu.get_tpu_info().vmem_capacity_bytes)
    except Exception:
        return 64 << 20  # conservative: v7x per-TensorCore VMEM


def _device_kind():
    try:
        return jax.devices()[0].device_kind.lower()
    except Exception:
        return ""


def _num_tensorcores_per_chip():
    kind = _device_kind()
    return 2 if ("v7" in kind or "7x" in kind) else 1


def _default_compute_dtype():
    kind = _device_kind()
    if "v6" in kind or "v7" in kind or "7x" in kind or "trillium" in kind:
        return jnp.bfloat16
    return jnp.float32


def prepare_concat_mlp2_params(weights, biases, compute_dtype):
    """Optional one-time preprocessing: cast weights to the compute dtype and
    biases to f32 so repeated forward calls do no per-call casting."""
    ws = [jnp.asarray(w, dtype=compute_dtype) for w in weights]
    bs = [jnp.asarray(b, dtype=jnp.float32) for b in biases]
    return ws, bs


# ---------------------------------------------------------------------------
# Forward wrapper.
# ---------------------------------------------------------------------------
def concat_mlp2_forward(z, weights, biases, *, block_m=512, compute_dtype=None,
                        out_dtype=None, single_buffer_weights=None):
    """Fused MLP forward: relu(... relu(relu(z@W1+b1)@W2+b2) ... ).

    z:       (B, input_dim)
    weights: list of (in_i, out_i) arrays (transposed from torch's (out, in))
    biases:  list of (1, out_i) arrays
    block_m: batch tile (multiple of 8; sweep 512-1024).  Capped to B; split
             across the 2 TensorCores only on v7x.
    compute_dtype: None -> bf16 on v6e/v7x else f32.  bf16 keeps f32
             accumulation but downcasts inter-layer activations to bf16.
    out_dtype: output dtype (default z.dtype; pass bf16 to halve write bytes
             if the consumer tolerates it).
    single_buffer_weights: None -> auto (single-buffer resident weights only
             when double-buffering would pressure VMEM, e.g. v7x's 64 MiB).

    Feature dims are NOT padded: input/output block last dims equal the full
    array widths (legal per the (8,128) rule), so there are no extra HBM
    pad/slice passes.  Don't pad small feature dims to 256 "for the MXU" --
    this kernel is DMA/overhead bound at small d, not MXU bound.
    """
    B, d_in = z.shape
    n_layers = len(weights)
    d_out = weights[-1].shape[1]

    if compute_dtype is None:
        compute_dtype = _default_compute_dtype()
    if out_dtype is None:
        out_dtype = z.dtype

    act_bytes = jnp.dtype(compute_dtype).itemsize
    in_bytes = jnp.dtype(z.dtype).itemsize
    out_bytes = jnp.dtype(out_dtype).itemsize

    # Cast params only if needed (pre-cast with prepare_concat_mlp2_params, or
    # keep this wrapper under jit, to avoid per-call casts).  Biases stay f32
    # and are added in the f32 accumulator.
    weights_c = [w if w.dtype == compute_dtype else w.astype(compute_dtype) for w in weights]
    biases_c = [b if b.dtype == jnp.float32 else b.astype(jnp.float32) for b in biases]

    # --- VMEM budget against the actual generation (v5e/v6e 128 MiB, v7x 64 MiB).
    vmem_cap = min(_tpu_vmem_capacity_bytes() - (8 << 20), 100 << 20)

    resident_w = sum(w.size * act_bytes + b.size * 4 for w, b in zip(weights_c, biases_c))
    if single_buffer_weights is None:
        # Only constrain the pipeline when resident weights are big enough to
        # pressure VMEM; tiny weights keep the default buffering.
        single_buffer_weights = (2 * resident_w) > (vmem_cap // 4)

    # --- Batch tile: multiple of 8.  Force >=2 grid steps only where there are
    # 2 TensorCores to feed (v7x megacore); on v5e/v6e a single big tile avoids
    # per-grid-step overhead (~0.35 us / ~600 cycles per step).
    ncores = _num_tensorcores_per_chip()
    if ncores > 1:
        bm = max(8, min(block_m, _round_up(pl.cdiv(B, ncores), 8)))
    else:
        bm = max(8, min(block_m, _round_up(B, 8)))
    grid = (pl.cdiv(B, bm),)

    # --- Block specs.  Weight/bias blocks are grid-invariant (resident).
    in_specs = [pl.BlockSpec((bm, d_in), lambda i: (i, 0))]
    args = [z]
    w_kwargs = dict(pipeline_mode=pl.Buffered(1)) if single_buffer_weights else {}
    for wp, bp in zip(weights_c, biases_c):
        in_specs.append(pl.BlockSpec(wp.shape, lambda i: (0, 0), **w_kwargs))
        in_specs.append(pl.BlockSpec(bp.shape, lambda i: (0, 0), **w_kwargs))
        args.extend([wp, bp])
    out_spec = pl.BlockSpec((bm, d_out), lambda i: (i, 0))

    # --- VMEM footprint estimate (tiles double-buffered, weights 1x or 2x).
    wbuf = 1 if single_buffer_weights else 2
    est = 2 * bm * d_in * in_bytes          # input tile
    est += 2 * bm * d_out * out_bytes       # output tile
    est += wbuf * resident_w
    # TODO(synk): if est exceeds vmem_cap (very large hidden_dim on v7x), tile
    # the widest layer over an extra 'arbitrary' K/N grid axis with a VMEM
    # accumulator (or split the layer chain across pallas_calls) instead of
    # keeping every weight resident.
    vmem_limit = int(min(max(2 * est, 32 << 20), vmem_cap))
    vmem_limit = max(vmem_limit, int(min(est + (4 << 20), vmem_cap)))

    kernel = functools.partial(_mlp_kernel, n_layers=n_layers)

    return pl.pallas_call(
        kernel,
        out_shape=jax.ShapeDtypeStruct((B, d_out), out_dtype),
        grid_spec=pltpu.PrefetchScalarGridSpec(
            num_scalar_prefetch=0,
            grid=grid,
            in_specs=in_specs,
            out_specs=out_spec,
        ),
        compiler_params=pltpu.CompilerParams(
            dimension_semantics=("parallel",),
            vmem_limit_bytes=vmem_limit,
        ),
    )(*args)


# ---------------------------------------------------------------------------
# Parameter init matching ConcatMLP2.__init__/initialize (normal, std=0.05).
# ---------------------------------------------------------------------------
def init_concat_mlp2_params(key, input_dim, hidden_dim, output_dim, n_layers, std=0.05):
    layer_dims = [hidden_dim] * (n_layers - 1) + [output_dim]
    weights, biases = [], []
    in_ch = input_dim
    for out_ch in layer_dims:
        key, kw, kb = jax.random.split(key, 3)
        # torch Linear weight is (out, in); we store its transpose (in, out).
        w_t = (std * jax.random.normal(kw, (out_ch, in_ch), dtype=jnp.float32)).T
        b = std * jax.random.normal(kb, (1, out_ch), dtype=jnp.float32)
        weights.append(jnp.asarray(w_t))
        biases.append(b)
        in_ch = out_ch
    # `scalar` parameter exists in the module but is unused in forward.
    key, ks = jax.random.split(key)
    scalar = std * jax.random.normal(ks, (1, 1), dtype=jnp.float32)
    return weights, biases, scalar


def _reference_forward(z, weights, biases):
    x = z
    for w, b in zip(weights, biases):
        x = jnp.maximum(x @ w + b, 0.0)
    return x


if __name__ == "__main__":
    # Small shapes consistent with the module's (B, d) input.
    B, input_dim, hidden_dim, output_dim, n_layers = 64, 32, 32, 32, 3

    key = jax.random.PRNGKey(0)
    key, kz = jax.random.split(key)
    z = jax.random.normal(kz, (B, input_dim), dtype=jnp.float32)

    weights, biases, _scalar = init_concat_mlp2_params(
        key, input_dim, hidden_dim, output_dim, n_layers, std=0.05
    )

    ref = _reference_forward(z, weights, biases)

    fwd = jax.jit(
        concat_mlp2_forward,
        static_argnames=("block_m", "compute_dtype", "out_dtype", "single_buffer_weights"),
    )

    # f32 compute path (bit-faithful to the torch module; tight tolerance).
    out_f32 = jax.block_until_ready(fwd(z, weights, biases, compute_dtype=jnp.float32))
    assert out_f32.shape == (B, output_dim)
    assert jnp.allclose(out_f32, ref, atol=1e-5, rtol=1e-5)

    # bf16 compute / f32 accumulate path (MXU fast path on v6e/v7x; looser tol).
    out_bf16 = jax.block_until_ready(fwd(z, weights, biases, compute_dtype=jnp.bfloat16))
    assert out_bf16.shape == (B, output_dim)
    assert jnp.allclose(out_bf16, ref, atol=5e-3, rtol=5e-2)

    print("KERNEL_OK")
</pallas_src>

<mosaic_0001>
module attributes {stable_mosaic.version = 11 : i64} {
  func.func @_mlp_kernel(%arg0: i32, %arg1: memref<64x32xf32, #tpu.memory_space<vmem>>, %arg2: memref<32x32xf32, #tpu.memory_space<vmem>>, %arg3: memref<1x32xf32, #tpu.memory_space<vmem>>, %arg4: memref<32x32xf32, #tpu.memory_space<vmem>>, %arg5: memref<1x32xf32, #tpu.memory_space<vmem>>, %arg6: memref<32x32xf32, #tpu.memory_space<vmem>>, %arg7: memref<1x32xf32, #tpu.memory_space<vmem>>, %arg8: memref<64x32xf32, #tpu.memory_space<vmem>>) attributes {dimension_semantics = [#tpu.dimension_semantics<parallel>], iteration_bounds = array<i64: 1>, scalar_prefetch = 0 : i64, scratch_operands = 0 : i64, tpu.core_type = #tpu.core_type<tc>, window_params = [{transform_indices = @transform_0, window_bounds = array<i64: 64, 32>}, {pipeline_mode = #tpu.pipeline_mode<synchronous>, transform_indices = @transform_1, window_bounds = array<i64: 32, 32>}, {pipeline_mode = #tpu.pipeline_mode<synchronous>, transform_indices = @transform_2, window_bounds = array<i64: 1, 32>}, {pipeline_mode = #tpu.pipeline_mode<synchronous>, transform_indices = @transform_3, window_bounds = array<i64: 32, 32>}, {pipeline_mode = #tpu.pipeline_mode<synchronous>, transform_indices = @transform_4, window_bounds = array<i64: 1, 32>}, {pipeline_mode = #tpu.pipeline_mode<synchronous>, transform_indices = @transform_5, window_bounds = array<i64: 32, 32>}, {pipeline_mode = #tpu.pipeline_mode<synchronous>, transform_indices = @transform_6, window_bounds = array<i64: 1, 32>}, {transform_indices = @transform_7, window_bounds = array<i64: 64, 32>}]} {
    %c0 = arith.constant 0 : index
    %c0_0 = arith.constant 0 : index
    %0 = vector.load %arg1[%c0, %c0_0] : memref<64x32xf32, #tpu.memory_space<vmem>>, vector<64x32xf32>
    %c0_1 = arith.constant 0 : index
    %c0_2 = arith.constant 0 : index
    %1 = vector.load %arg2[%c0_1, %c0_2] : memref<32x32xf32, #tpu.memory_space<vmem>>, vector<32x32xf32>
    %cst = arith.constant dense<0.000000e+00> : vector<64x32xf32>
    %2 = tpu.matmul %0, %1, %cst {dimension_numbers = #tpu.dot_dimension_numbers<[1], [0], [0], [1], [0, 0, 1, 1], [], []>} : vector<64x32xf32>, vector<32x32xf32>, vector<64x32xf32> -> vector<64x32xf32>
    %c0_3 = arith.constant 0 : index
    %c0_4 = arith.constant 0 : index
    %3 = vector.load %arg3[%c0_3, %c0_4] : memref<1x32xf32, #tpu.memory_space<vmem>>, vector<1x32xf32>
    %4 = vector.broadcast %3 : vector<1x32xf32> to vector<64x32xf32>
    %5 = arith.addf %2, %4 : vector<64x32xf32>
    %cst_5 = arith.constant 0.000000e+00 : f32
    %6 = vector.broadcast %cst_5 : f32 to vector<64x32xf32>
    %7 = arith.maximumf %5, %6 : vector<64x32xf32>
    %c0_6 = arith.constant 0 : index
    %c0_7 = arith.constant 0 : index
    %8 = vector.load %arg4[%c0_6, %c0_7] : memref<32x32xf32, #tpu.memory_space<vmem>>, vector<32x32xf32>
    %cst_8 = arith.constant dense<0.000000e+00> : vector<64x32xf32>
    %9 = tpu.matmul %7, %8, %cst_8 {dimension_numbers = #tpu.dot_dimension_numbers<[1], [0], [0], [1], [0, 0, 1, 1], [], []>} : vector<64x32xf32>, vector<32x32xf32>, vector<64x32xf32> -> vector<64x32xf32>
    %c0_9 = arith.constant 0 : index
    %c0_10 = arith.constant 0 : index
    %10 = vector.load %arg5[%c0_9, %c0_10] : memref<1x32xf32, #tpu.memory_space<vmem>>, vector<1x32xf32>
    %11 = vector.broadcast %10 : vector<1x32xf32> to vector<64x32xf32>
    %12 = arith.addf %9, %11 : vector<64x32xf32>
    %cst_11 = arith.constant 0.000000e+00 : f32
    %13 = vector.broadcast %cst_11 : f32 to vector<64x32xf32>
    %14 = arith.maximumf %12, %13 : vector<64x32xf32>
    %c0_12 = arith.constant 0 : index
    %c0_13 = arith.constant 0 : index
    %15 = vector.load %arg6[%c0_12, %c0_13] : memref<32x32xf32, #tpu.memory_space<vmem>>, vector<32x32xf32>
    %cst_14 = arith.constant dense<0.000000e+00> : vector<64x32xf32>
    %16 = tpu.matmul %14, %15, %cst_14 {dimension_numbers = #tpu.dot_dimension_numbers<[1], [0], [0], [1], [0, 0, 1, 1], [], []>} : vector<64x32xf32>, vector<32x32xf32>, vector<64x32xf32> -> vector<64x32xf32>
    %c0_15 = arith.constant 0 : index
    %c0_16 = arith.constant 0 : index
    %17 = vector.load %arg7[%c0_15, %c0_16] : memref<1x32xf32, #tpu.memory_space<vmem>>, vector<1x32xf32>
    %18 = vector.broadcast %17 : vector<1x32xf32> to vector<64x32xf32>
    %19 = arith.addf %16, %18 : vector<64x32xf32>
    %cst_17 = arith.constant 0.000000e+00 : f32
    %20 = vector.broadcast %cst_17 : f32 to vector<64x32xf32>
    %21 = arith.maximumf %19, %20 : vector<64x32xf32>
    %c0_18 = arith.constant 0 : index
    %c0_19 = arith.constant 0 : index
    %22 = vector.load %arg8[%c0_18, %c0_19] : memref<64x32xf32, #tpu.memory_space<vmem>>, vector<64x32xf32>
    tpu.vector_store %arg8[%c0_18, %c0_19], %21 {strides = array<i32>} : memref<64x32xf32, #tpu.memory_space<vmem>>, vector<64x32xf32>,
    return
  }
  func.func @transform_0(%arg0: i32) -> (i32, i32) {
    %c0_i32 = arith.constant 0 : i32
    %c0_i32_0 = arith.constant 0 : i32
    return %arg0, %c0_i32 : i32, i32
  }
  func.func @transform_1(%arg0: i32) -> (i32, i32) {
    %c0_i32 = arith.constant 0 : i32
    %c0_i32_0 = arith.constant 0 : i32
    %c0_i32_1 = arith.constant 0 : i32
    return %c0_i32, %c0_i32_0 : i32, i32
  }
  func.func @transform_2(%arg0: i32) -> (i32, i32) {
    %c0_i32 = arith.constant 0 : i32
    %c0_i32_0 = arith.constant 0 : i32
    %c0_i32_1 = arith.constant 0 : i32
    return %c0_i32, %c0_i32_0 : i32, i32
  }
  func.func @transform_3(%arg0: i32) -> (i32, i32) {
    %c0_i32 = arith.constant 0 : i32
    %c0_i32_0 = arith.constant 0 : i32
    %c0_i32_1 = arith.constant 0 : i32
    return %c0_i32, %c0_i32_0 : i32, i32
  }
  func.func @transform_4(%arg0: i32) -> (i32, i32) {
    %c0_i32 = arith.constant 0 : i32
    %c0_i32_0 = arith.constant 0 : i32
    %c0_i32_1 = arith.constant 0 : i32
    return %c0_i32, %c0_i32_0 : i32, i32
  }
  func.func @transform_5(%arg0: i32) -> (i32, i32) {
    %c0_i32 = arith.constant 0 : i32
    %c0_i32_0 = arith.constant 0 : i32
    %c0_i32_1 = arith.constant 0 : i32
    return %c0_i32, %c0_i32_0 : i32, i32
  }
  func.func @transform_6(%arg0: i32) -> (i32, i32) {
    %c0_i32 = arith.constant 0 : i32
    %c0_i32_0 = arith.constant 0 : i32
    %c0_i32_1 = arith.constant 0 : i32
    return %c0_i32, %c0_i32_0 : i32, i32
  }
  func.func @transform_7(%arg0: i32) -> (i32, i32) {
    %c0_i32 = arith.constant 0 : i32
    %c0_i32_0 = arith.constant 0 : i32
    return %arg0, %c0_i32 : i32, i32
  }
}

</mosaic_0001>

<bundles_post_ra>
// kernel: concat_mlp2_forward.1
= control target key start
LH: loop header
LB: loop body
LE: loop exit
PB: predicated region body
PF: predicated region fallthrough
CT: control target
= control target key end

     0   :  { %vm45_vm0 = vcmask 261120   ;;  %s807_s1 = inlined_call_operand.vmem [shape: f32[32,32], index: 1, kind: input, shape index: {}]   ;;  %s808_s0 = inlined_call_operand.vmem [shape: f32[64,32], index: 0, kind: input, shape index: {}]   ;;  %s809_s3 = inlined_call_operand.vmem [shape: f32[32,32], index: 3, kind: input, shape index: {}]   ;;  %s810_s5 = inlined_call_operand.vmem [shape: f32[32,32], index: 5, kind: input, shape index: {}]   ;;  %s811_s2 = inlined_call_operand.vmem [shape: f32[1,32], index: 2, kind: input, shape index: {}]   ;;  %s812_s4 = inlined_call_operand.vmem [shape: f32[1,32], index: 4, kind: input, shape index: {}]   ;;  %s813_s6 = inlined_call_operand.vmem [shape: f32[1,32], index: 6, kind: input, shape index: {}]   ;;  %s814_s7 = inlined_call_operand.vmem [shape: f32[64,32], index: 7, kind: output, shape index: {}]  }
   0x1   :  { %v34_v0 = vld [vmem:[%s807_s1] sm:$0xff]  ;;  %v35_v1 = vld [vmem:[%s807_s1 + $0x8] sm:$0xff]  ;;  %v36_v2 = vld [vmem:[%s807_s1 + $0x10] sm:$0xff] }
   0x2   :  { %v614_v3 = vpack.c.bf16 %v35_v1, %v34_v0  ;;  %v37_v4 = vld [vmem:[%s807_s1 + $0x18] sm:$0xff]  ;;  %v26_v5 = vld [vmem:[%s808_s0] sm:$0xff]  ;;  %v184_v9 = vld [vmem:[%s809_s3 + $0x8] sm:$0xff] }
   0x3   :  { %v618_v6 = vpack.c.bf16 %v37_v4, %v36_v2  ;;  %562 = vmatprep.mubr.msk.f32.mxu0 %vm45_vm0, %v26_v5  ;;  %v30_v7 = vld [vmem:[%s808_s0 + $0x20] sm:$0xff]  ;;  %v27_v11 = vld [vmem:[%s808_s0 + $0x8] sm:$0xff]  ;;  %v28_v13 = vld [vmem:[%s808_s0 + $0x10] sm:$0xff] }
   0x4   :  { %615 = vmatprep.subr.bf16.mxu0 %v614_v3  ;;  %638 = vmatprep.subr.bf16.mxu1 %v614_v3  ;;  %v183_v8 = vld [vmem:[%s809_s3] sm:$0xff]  ;;  %v31_v12 = vld [vmem:[%s808_s0 + $0x28] sm:$0xff]  ;;  %v32_v14 = vld [vmem:[%s808_s0 + $0x30] sm:$0xff] }
   0x5   :  { %617 = vmatpush3.bf16.msra.mxu0 %v614_v3  ;;  %640 = vmatpush3.bf16.msra.mxu1 %v614_v3  ;;  %v622_v10 = vpack.c.bf16 %v184_v9, %v183_v8  ;;  %v29_v15 = vld [vmem:[%s808_s0 + $0x18] sm:$0xff]  ;;  %v185_v17 = vld [vmem:[%s809_s3 + $0x10] sm:$0xff]  ;;  %v331_v20 = vld [vmem:[%s810_s5] sm:$0xff] }
   0x6   :  { %619 = vmatprep.subr.bf16.mxu0 %v618_v6  ;;  %639 = vmatprep.subr.bf16.mxu1 %v618_v6  ;;  %v33_v16 = vld [vmem:[%s808_s0 + $0x38] sm:$0xff]  ;;  %v332_v21 = vld [vmem:[%s810_s5 + $0x8] sm:$0xff]  ;;  %v491_v23 = vld [vmem:[%s811_s2] ss:$0 sm:$0xff] }
   0x7   :  { %568 = vmatprep.mubr.msk.f32.mxu1 %vm45_vm0, %v30_v7  ;;  %v186_v18 = vld [vmem:[%s809_s3 + $0x18] sm:$0xff]  ;;  %v630_v22 = vpack.c.bf16 %v332_v21, %v331_v20  ;;  %v333_v48 = vld [vmem:[%s810_s5 + $0x10] sm:$0xff]  ;;  %v500_v51 = vld [vmem:[%s812_s4] ss:$0 sm:$0xff] }
   0x8   :  { %v626_v19 = vpack.c.bf16 %v186_v18, %v185_v17  ;;  %v334_v49 = vld [vmem:[%s810_s5 + $0x18] sm:$0xff] }
   0x9   :  { %621 = vmatpush3.bf16.msra.mxu0 %v618_v6  ;;  %641 = vmatpush3.bf16.msra.mxu1 %v618_v6  ;;  %v634_v50 = vpack.c.bf16 %v334_v49, %v333_v48 }
   0xa   :  { %623 = vmatprep.subr.bf16.mxu1 %v622_v10  ;;  %631 = vmatprep.subr.bf16.mxu0 %v630_v22 }
   0xc   :  { %563 = vmatmul.mubr.msk.f32.vlgmr.msra.gmra.mrb[0].mxu0 %vm45_vm0, %v27_v11  ;;  %569 = vmatmul.mubr.msk.f32.vlgmr.msra.gmra.mrb[0].mxu1 %vm45_vm0, %v31_v12  ;;  %v509_v12 = vld [vmem:[%s813_s6] ss:$0 sm:$0xff] }
   0xd   :  { %565 = vmatprep.mubr.msk.f32.mxu0 %vm45_vm0, %v28_v13  ;;  %571 = vmatprep.mubr.msk.f32.mxu1 %vm45_vm0, %v32_v14 }
   0xe   :  { %625 = vmatpush3.bf16.msra.mxu1 %v622_v10  ;;  %633 = vmatpush3.bf16.msra.mxu0 %v630_v22 }
   0xf   :  { %627 = vmatprep.subr.bf16.mxu1 %v626_v19  ;;  %635 = vmatprep.subr.bf16.mxu0 %v634_v50 }
  0x10   :  { %566 = vmatmul.mubr.msk.f32.gmra.mrb[2].mxu0 %vm45_vm0, %v29_v15  ;;  %572 = vmatmul.mubr.msk.f32.gmra.mrb[2].mxu1 %vm45_vm0, %v33_v16 }
  0x12   :  { %629 = vmatpush3.bf16.msra.mxu1 %v626_v19  ;;  %637 = vmatpush3.bf16.msra.mxu0 %v634_v50 }
  0xdf   :  { %v564_v24 = vpop.f32.mrb[0].mxu0  ;;  %v570_v25 = vpop.f32.mrb[0].mxu1 }
  0xe0   :  { %v142_v26 = vadd.f32 %v564_v24, %v491_v23  ;;  %v136_v27 = vpop.f32.mrb[1].mxu0  ;;  %v156_v28 = vpop.f32.mrb[1].mxu1  ;;  %v162_v43 = vadd.f32 %v570_v25, %v491_v23 }
  0xe1   :  { %v137_v29 = vadd.f32 %v491_v23, %v136_v27  ;;  %v157_v32 = vadd.f32 %v491_v23, %v156_v28 }
  0xe2   :  { %v176_v34 = vmax.f32 %v142_v26, 0.0  ;;  %v180_v45 = vmax.f32 %v162_v43, 0.0 }
  0xe3   :  { %v175_v30 = vmax.f32 %v137_v29, 0.0  ;;  %v567_v31 = vpop.f32.mrb[2].mxu0  ;;  %v573_v33 = vpop.f32.mrb[2].mxu1  ;;  %v179_v40 = vmax.f32 %v157_v32, 0.0 }
  0xe4   :  { %v152_v35 = vadd.f32 %v567_v31, %v491_v23  ;;  %v146_v36 = vpop.f32.mrb[3].mxu0  ;;  %v166_v37 = vpop.f32.mrb[3].mxu1  ;;  %v172_v46 = vadd.f32 %v573_v33, %v491_v23 }
  0xe5   :  { %v147_v38 = vadd.f32 %v491_v23, %v146_v36  ;;  %582 = vmatprep.mubr.msk.f32.mxu1 %vm45_vm0, %v175_v30  ;;  %v167_v41 = vadd.f32 %v491_v23, %v166_v37 }
  0xe6   :  { %583 = vmatmul.mubr.msk.f32.vlgmr.msra.gmra.mrb[4].mxu1 %vm45_vm0, %v176_v34  ;;  %v178_v42 = vmax.f32 %v152_v35, 0.0  ;;  %v182_v47 = vmax.f32 %v172_v46, 0.0 }
  0xe7   :  { %v177_v39 = vmax.f32 %v147_v38, 0.0  ;;  %v181_v44 = vmax.f32 %v167_v41, 0.0 }
  0xe9   :  { %585 = vmatprep.mubr.msk.f32.mxu1 %vm45_vm0, %v177_v39 }
  0xea   :  { %586 = vmatmul.mubr.msk.f32.gmra.mrb[6].mxu1 %vm45_vm0, %v178_v42 }
  0xeb   :  { %588 = vmatprep.mubr.msk.f32.mxu1 %vm45_vm0, %v179_v40 }
  0xee   :  { %589 = vmatmul.mubr.msk.f32.gmra.mrb[8].mxu1 %vm45_vm0, %v180_v45 }
  0xef   :  { %591 = vmatprep.mubr.msk.f32.mxu1 %vm45_vm0, %v181_v44 }
  0xf2   :  { %592 = vmatmul.mubr.msk.f32.gmra.mrb[10].mxu1 %vm45_vm0, %v182_v47 }
 0x1b9   :  { %v584_v52 = vpop.f32.mrb[4].mxu1 }
 0x1ba   :  { %v290_v53 = vadd.f32 %v584_v52, %v500_v51  ;;  %v284_v54 = vpop.f32.mrb[5].mxu1 }
 0x1bb   :  { %v285_v55 = vadd.f32 %v500_v51, %v284_v54 }
 0x1bc   :  { %v324_v58 = vmax.f32 %v290_v53, 0.0 }
 0x1bd   :  { %v323_v56 = vmax.f32 %v285_v55, 0.0  ;;  %v587_v57 = vpop.f32.mrb[6].mxu1 }
 0x1be   :  { %v300_v59 = vadd.f32 %v587_v57, %v500_v51  ;;  %v294_v60 = vpop.f32.mrb[7].mxu1 }
 0x1bf   :  { %v295_v61 = vadd.f32 %v500_v51, %v294_v60  ;;  %602 = vmatprep.mubr.msk.f32.mxu0 %vm45_vm0, %v323_v56 }
 0x1c0   :  { %603 = vmatmul.mubr.msk.f32.vlgmr.msra.gmra.mrb[4].mxu0 %vm45_vm0, %v324_v58  ;;  %v326_v0 = vmax.f32 %v300_v59, 0.0 }
 0x1c1   :  { %v325_v62 = vmax.f32 %v295_v61, 0.0  ;;  %v590_v63 = vpop.f32.mrb[8].mxu1 }
 0x1c2   :  { %v310_v1 = vadd.f32 %v590_v63, %v500_v51  ;;  %v304_v2 = vpop.f32.mrb[9].mxu1 }
 0x1c3   :  { %v305_v3 = vadd.f32 %v500_v51, %v304_v2  ;;  %605 = vmatprep.mubr.msk.f32.mxu0 %vm45_vm0, %v325_v62 }
 0x1c4   :  { %606 = vmatmul.mubr.msk.f32.gmra.mrb[6].mxu0 %vm45_vm0, %v326_v0  ;;  %v328_v6 = vmax.f32 %v310_v1, 0.0 }
 0x1c5   :  { %v327_v4 = vmax.f32 %v305_v3, 0.0  ;;  %v593_v5 = vpop.f32.mrb[10].mxu1 }
 0x1c6   :  { %v320_v7 = vadd.f32 %v593_v5, %v500_v51  ;;  %v314_v8 = vpop.f32.mrb[11].mxu1 }
 0x1c7   :  { %v315_v9 = vadd.f32 %v500_v51, %v314_v8  ;;  %608 = vmatprep.mubr.msk.f32.mxu0 %vm45_vm0, %v327_v4 }
 0x1c8   :  { %609 = vmatmul.mubr.msk.f32.gmra.mrb[8].mxu0 %vm45_vm0, %v328_v6  ;;  %v330_v11 = vmax.f32 %v320_v7, 0.0 }
 0x1c9   :  { %v329_v10 = vmax.f32 %v315_v9, 0.0 }
 0x1cb   :  { %611 = vmatprep.mubr.msk.f32.mxu0 %vm45_vm0, %v329_v10 }
 0x1cc   :  { %612 = vmatmul.mubr.msk.f32.gmra.mrb[10].mxu0 %vm45_vm0, %v330_v11 }
 0x293   :  { %v604_v13 = vpop.f32.mrb[4].mxu0 }
 0x294   :  { %v438_v14 = vadd.f32 %v604_v13, %v509_v12  ;;  %v432_v15 = vpop.f32.mrb[5].mxu0 }
 0x295   :  { %v433_v16 = vadd.f32 %v509_v12, %v432_v15 }
 0x296   :  { %v472_v17 = vmax.f32 %v438_v14, 0.0 }
 0x297   :  { %v471_v18 = vmax.f32 %v433_v16, 0.0  ;;  %v607_v19 = vpop.f32.mrb[6].mxu0 }
 0x298   :  { %480 = vst.msk [vmem:[%s814_s7 + $0x8] sm:$0xff] %vm45_vm0, %v472_v17  ;;  %v448_v20 = vadd.f32 %v607_v19, %v509_v12  ;;  %v442_v21 = vpop.f32.mrb[7].mxu0 }
 0x299   :  { %479 = vst.msk [vmem:[%s814_s7] sm:$0xff] %vm45_vm0, %v471_v18  ;;  %v443_v22 = vadd.f32 %v509_v12, %v442_v21 }
 0x29a   :  { %v474_v23 = vmax.f32 %v448_v20, 0.0 }
 0x29b   :  { %v473_v24 = vmax.f32 %v443_v22, 0.0  ;;  %v610_v25 = vpop.f32.mrb[8].mxu0 }
 0x29c   :  { %482 = vst.msk [vmem:[%s814_s7 + $0x18] sm:$0xff] %vm45_vm0, %v474_v23  ;;  %v458_v26 = vadd.f32 %v610_v25, %v509_v12  ;;  %v452_v27 = vpop.f32.mrb[9].mxu0 }
 0x29d   :  { %481 = vst.msk [vmem:[%s814_s7 + $0x10] sm:$0xff] %vm45_vm0, %v473_v24  ;;  %v453_v28 = vadd.f32 %v509_v12, %v452_v27 }
 0x29e   :  { %v476_v29 = vmax.f32 %v458_v26, 0.0 }
 0x29f   :  { %v475_v30 = vmax.f32 %v453_v28, 0.0  ;;  %v613_v31 = vpop.f32.mrb[10].mxu0 }
 0x2a0   :  { %484 = vst.msk [vmem:[%s814_s7 + $0x28] sm:$0xff] %vm45_vm0, %v476_v29  ;;  %v468_v32 = vadd.f32 %v613_v31, %v509_v12  ;;  %v462_v33 = vpop.f32.mrb[11].mxu0 }
 0x2a1   :  { %483 = vst.msk [vmem:[%s814_s7 + $0x20] sm:$0xff] %vm45_vm0, %v475_v30  ;;  %v463_v34 = vadd.f32 %v509_v12, %v462_v33 }
 0x2a2   :  { %v478_v35 = vmax.f32 %v468_v32, 0.0 }
 0x2a3   :  { %v477_v36 = vmax.f32 %v463_v34, 0.0 }
 0x2a4   :  { %486 = vst.msk [vmem:[%s814_s7 + $0x38] sm:$0xff] %vm45_vm0, %v478_v35 }
 0x2a5   :  { %485 = vst.msk [vmem:[%s814_s7 + $0x30] sm:$0xff] %vm45_vm0, %v477_v36 }

</bundles_post_ra>
